<compile_context>
chip_gen: v7x
topology: tpu7x:2x2x1
jax: 0.10.0
libtpu: 0.0.40
codegen_flags: <defaults>
</compile_context>

<pallas_src>
import jax
import jax.numpy as jnp
from jax.experimental import pallas as pl
from jax.experimental.pallas import tpu as pltpu


INPUT_DIM = 40
OUTPUT_DIM = 32
CONTEXT = 3
DILATION = 1
STRIDE = 3
BN_EPS = 1e-5

GROUP = 4                          # frames packed per lane-dense output row (4 * 32 = 128 lanes)
KG = GROUP * CONTEXT * INPUT_DIM   # 480
NG = GROUP * OUTPUT_DIM            # 128
MAX_TILE_MG = 2048                 # grouped rows per grid step (~3.75 MiB input tile, f32)


def _tdnn_kernel(xg_ref, wg_ref, p_ref, o_ref):
    # xg_ref: (TILE_MG, 480)  four consecutive unfolded frames per row
    # wg_ref: (480, 128)      block-diagonal replicated linear weight (W^T x4)
    # p_ref:  (8, 128)        epilogue params; row 0 = linear bias, row 1 = BN scale,
    #                         row 2 = BN shift (each tiled x GROUP), rest zero-pad
    # o_ref:  (TILE_MG, 128)  four consecutive output frames per row
    y = jnp.dot(xg_ref[...], wg_ref[...], preferred_element_type=jnp.float32)
    y = jnp.maximum(y + p_ref[0:1, :], 0.0)                  # Linear bias + ReLU
    o_ref[...] = (y * p_ref[1:2, :] + p_ref[2:3, :]).astype(o_ref.dtype)


def classifier2_forward(x, params):
    """x: (B, T, INPUT_DIM) float32 -> (B, T_out, OUTPUT_DIM) float32."""
    B, T, D = x.shape
    assert D == INPUT_DIM
    t_out = (T - DILATION * (CONTEXT - 1) - 1) // STRIDE + 1
    assert t_out >= 1

    # --- unfold over time: stride (3) == context*dilation (3) => windows are
    #     non-overlapping and contiguous, so the unfold is a plain reshape. ---
    t_used = t_out * STRIDE
    x = x.astype(jnp.float32)
    if t_used != T:
        x = x[:, :t_used, :]
    frames = x.reshape(B * t_out, CONTEXT * INPUT_DIM)       # (M, 120), zero-copy
    M = B * t_out

    # Group 4 consecutive frames per row -> lane-dense (.., 480) input / (.., 128) output.
    M_pad = ((M + GROUP - 1) // GROUP) * GROUP
    if M_pad != M:
        # Rare corner case (M % 4 != 0): pays one extra pass over `frames` in HBM.
        frames = jnp.pad(frames, ((0, M_pad - M), (0, 0)))
    MG = M_pad // GROUP
    frames_g = frames.reshape(MG, KG)                        # (MG, 480), zero-copy

    # --- parameter prep (tiny, done once in the wrapper) ---
    w_t = params["weight"].astype(jnp.float32).T             # (120, 32)
    w_g = jnp.kron(jnp.eye(GROUP, dtype=jnp.float32), w_t)   # (480, 128) block-diagonal
    scale = params["bn_weight"] * jax.lax.rsqrt(params["bn_running_var"] + BN_EPS)
    shift = params["bn_bias"] - params["bn_running_mean"] * scale
    epi = jnp.zeros((8, NG), jnp.float32)                    # one sublane-aligned tile
    epi = epi.at[0].set(jnp.tile(params["bias"].astype(jnp.float32), GROUP))
    epi = epi.at[1].set(jnp.tile(scale.astype(jnp.float32), GROUP))
    epi = epi.at[2].set(jnp.tile(shift.astype(jnp.float32), GROUP))

    # --- tiling over the (grouped) row axis ---
    tile_mg = MG if MG <= MAX_TILE_MG else MAX_TILE_MG       # full block or multiple of 8
    grid = (pl.cdiv(MG, tile_mg),)

    cost = pl.CostEstimate(
        flops=2 * MG * KG * NG,
        transcendentals=0,
        bytes_accessed=(MG * KG * 4 + KG * NG * 4 + MG * NG * 4),
    )

    out_g = pl.pallas_call(
        _tdnn_kernel,
        out_shape=jax.ShapeDtypeStruct((MG, NG), jnp.float32),
        grid=grid,
        in_specs=[
            pl.BlockSpec((tile_mg, KG), lambda i: (i, 0)),
            pl.BlockSpec((KG, NG), lambda i: (0, 0)),
            pl.BlockSpec((8, NG), lambda i: (0, 0)),
        ],
        out_specs=pl.BlockSpec((tile_mg, NG), lambda i: (i, 0)),
        compiler_params=pltpu.CompilerParams(
            dimension_semantics=("parallel",)),
        cost_estimate=cost,
    )(frames_g, w_g, epi)

    # (MG, 128) -> (M_pad, 32) is a zero-copy reshape; drop pad rows, restore (B, T_out, N).
    out = out_g.reshape(M_pad, OUTPUT_DIM)[:M]
    return out.reshape(B, t_out, OUTPUT_DIM)


def init_params(key):
    k_w, k_b = jax.random.split(key)
    fan_in = CONTEXT * INPUT_DIM
    bound = 1.0 / jnp.sqrt(fan_in)
    weight = jax.random.uniform(k_w, (OUTPUT_DIM, fan_in), jnp.float32, -bound, bound)
    bias = jax.random.uniform(k_b, (OUTPUT_DIM,), jnp.float32, -bound, bound)
    return {
        "weight": weight,
        "bias": bias,
        "bn_weight": jnp.ones((OUTPUT_DIM,), jnp.float32),
        "bn_bias": jnp.zeros((OUTPUT_DIM,), jnp.float32),
        "bn_running_mean": jnp.zeros((OUTPUT_DIM,), jnp.float32),
        "bn_running_var": jnp.ones((OUTPUT_DIM,), jnp.float32),
    }


def _reference(x, params):
    B, T, _ = x.shape
    t_out = (T - DILATION * (CONTEXT - 1) - 1) // STRIDE + 1
    starts = jnp.arange(t_out) * STRIDE
    offsets = jnp.arange(CONTEXT) * DILATION
    frames = x[:, starts[:, None] + offsets[None, :], :].reshape(B, t_out, -1)
    y = jnp.maximum(frames @ params["weight"].T + params["bias"], 0.0)
    y = (y - params["bn_running_mean"]) / jnp.sqrt(params["bn_running_var"] + BN_EPS)
    return y * params["bn_weight"] + params["bn_bias"]


if __name__ == "__main__":
    key = jax.random.PRNGKey(0)
    k_x1, k_x2, k_p = jax.random.split(key, 3)
    params = init_params(k_p)

    # Case 1: seq len 24 -> t_out = 8, M = 16 (exactly grouped, no slice/pad needed).
    B1, T1 = 2, 24
    x1 = jax.random.normal(k_x1, (B1, T1, INPUT_DIM), dtype=jnp.float32)
    out1 = jax.block_until_ready(classifier2_forward(x1, params))
    assert out1.shape == (B1, 8, OUTPUT_DIM)
    assert jnp.allclose(out1, _reference(x1, params), atol=1e-4, rtol=1e-5)

    # Case 2: seq len 17 -> t_out = 5, M = 5 (exercises the tail-slice and row-pad paths).
    B2, T2 = 1, 17
    x2 = jax.random.normal(k_x2, (B2, T2, INPUT_DIM), dtype=jnp.float32)
    out2 = jax.block_until_ready(classifier2_forward(x2, params))
    assert out2.shape == (B2, 5, OUTPUT_DIM)
    assert jnp.allclose(out2, _reference(x2, params), atol=1e-4, rtol=1e-5)

    print("KERNEL_OK")
</pallas_src>

<mosaic_0001>
module attributes {stable_mosaic.version = 11 : i64} {
  func.func @_tdnn_kernel(%arg0: i32, %arg1: memref<4x480xf32, #tpu.memory_space<vmem>>, %arg2: memref<480x128xf32, #tpu.memory_space<vmem>>, %arg3: memref<8x128xf32, #tpu.memory_space<vmem>>, %arg4: memref<4x128xf32, #tpu.memory_space<vmem>>) attributes {dimension_semantics = [#tpu.dimension_semantics<parallel>], iteration_bounds = array<i64: 1>, scalar_prefetch = 0 : i64, scratch_operands = 0 : i64, tpu.core_type = #tpu.core_type<tc>, window_params = [{transform_indices = @transform_0, window_bounds = array<i64: 4, 480>}, {pipeline_mode = #tpu.pipeline_mode<synchronous>, transform_indices = @transform_1, window_bounds = array<i64: 480, 128>}, {pipeline_mode = #tpu.pipeline_mode<synchronous>, transform_indices = @transform_2, window_bounds = array<i64: 8, 128>}, {transform_indices = @transform_3, window_bounds = array<i64: 4, 128>}]} {
    %c0 = arith.constant 0 : index
    %c0_0 = arith.constant 0 : index
    %0 = vector.load %arg1[%c0, %c0_0] : memref<4x480xf32, #tpu.memory_space<vmem>>, vector<4x480xf32>
    %c0_1 = arith.constant 0 : index
    %c0_2 = arith.constant 0 : index
    %1 = vector.load %arg2[%c0_1, %c0_2] : memref<480x128xf32, #tpu.memory_space<vmem>>, vector<480x128xf32>
    %cst = arith.constant dense<0.000000e+00> : vector<4x128xf32>
    %2 = tpu.matmul %0, %1, %cst {dimension_numbers = #tpu.dot_dimension_numbers<[1], [0], [0], [1], [0, 0, 1, 1], [], []>} : vector<4x480xf32>, vector<480x128xf32>, vector<4x128xf32> -> vector<4x128xf32>
    %c0_3 = arith.constant 0 : index
    %c0_4 = arith.constant 0 : index
    %3 = vector.load %arg3[%c0_3, %c0_4] : memref<8x128xf32, #tpu.memory_space<vmem>>, vector<1x128xf32>
    %4 = vector.broadcast %3 : vector<1x128xf32> to vector<4x128xf32>
    %5 = arith.addf %2, %4 : vector<4x128xf32>
    %cst_5 = arith.constant 0.000000e+00 : f32
    %6 = vector.broadcast %cst_5 : f32 to vector<4x128xf32>
    %7 = arith.maximumf %5, %6 : vector<4x128xf32>
    %c1 = arith.constant 1 : index
    %c0_6 = arith.constant 0 : index
    %8 = vector.load %arg3[%c1, %c0_6] : memref<8x128xf32, #tpu.memory_space<vmem>>, vector<1x128xf32>
    %9 = vector.broadcast %8 : vector<1x128xf32> to vector<4x128xf32>
    %10 = arith.mulf %7, %9 : vector<4x128xf32>
    %c2 = arith.constant 2 : index
    %c0_7 = arith.constant 0 : index
    %11 = vector.load %arg3[%c2, %c0_7] : memref<8x128xf32, #tpu.memory_space<vmem>>, vector<1x128xf32>
    %12 = vector.broadcast %11 : vector<1x128xf32> to vector<4x128xf32>
    %13 = arith.addf %10, %12 : vector<4x128xf32>
    %c0_8 = arith.constant 0 : index
    %c0_9 = arith.constant 0 : index
    %14 = vector.load %arg4[%c0_8, %c0_9] : memref<4x128xf32, #tpu.memory_space<vmem>>, vector<4x128xf32>
    tpu.vector_store %arg4[%c0_8, %c0_9], %13 {strides = array<i32>} : memref<4x128xf32, #tpu.memory_space<vmem>>, vector<4x128xf32>,
    return
  }
  func.func @transform_0(%arg0: i32) -> (i32, i32) {
    %c0_i32 = arith.constant 0 : i32
    %c0_i32_0 = arith.constant 0 : i32
    return %arg0, %c0_i32 : i32, i32
  }
  func.func @transform_1(%arg0: i32) -> (i32, i32) {
    %c0_i32 = arith.constant 0 : i32
    %c0_i32_0 = arith.constant 0 : i32
    %c0_i32_1 = arith.constant 0 : i32
    return %c0_i32, %c0_i32_0 : i32, i32
  }
  func.func @transform_2(%arg0: i32) -> (i32, i32) {
    %c0_i32 = arith.constant 0 : i32
    %c0_i32_0 = arith.constant 0 : i32
    %c0_i32_1 = arith.constant 0 : i32
    return %c0_i32, %c0_i32_0 : i32, i32
  }
  func.func @transform_3(%arg0: i32) -> (i32, i32) {
    %c0_i32 = arith.constant 0 : i32
    %c0_i32_0 = arith.constant 0 : i32
    return %arg0, %c0_i32 : i32, i32
  }
}

</mosaic_0001>

<bundles_post_ra>
// kernel: tpu_custom_call.1
= control target key start
LH: loop header
LB: loop body
LE: loop exit
PB: predicated region body
PF: predicated region fallthrough
CT: control target
= control target key end

     0   :  { %8 = vsyncpa [#allocation3], 0  ;;  %s607_s0 = inlined_call_operand.hbm [shape: f32[4,480], index: 0, kind: input, shape index: {}]   ;;  %s608_s1 = inlined_call_operand.hbm [shape: f32[480,128], index: 1, kind: input, shape index: {}]   ;;  %s609_s2 = inlined_call_operand.hbm [shape: f32[8,128], index: 2, kind: input, shape index: {}]   ;;  %s610_s3 = inlined_call_operand.hbm [shape: f32[4,128], index: 3, kind: output, shape index: {}]  }
   0x1   :  { %9 = vsyncpa [#allocation6], 0 }
   0x2   :  { %10 = vsyncpa [#allocation4], 0  ;;  %s513_s12 = smov [#allocation5]   ;;  %s419_s16 = scalar_lea.hbm %s608_s1, 7680 }
   0x3   :  { %s26_s13 = sshll.u32 %s513_s12, 4  ;;  %p420_p0 = scmp.ne.s32.totalorder %s608_s1, %s419_s16  ;;  %s27_s13 = int_to_ptr.vmem [resolvable:$true] %s26_s13 }
   0x4   :  { %p423_p1 = scmp.lt.u32.totalorder %s419_s16, %s608_s1 }
   0x6   :  { %p425_p2 = pnand %p423_p1, %p420_p0 }
   0x8   :  { %428 = shalt.err (!%p425_p2)
}
   0x9   :  { %s429_s21 = scalar_lea.vmem %s27_s13, 7680  ;;  %p434_p4 = scmp.lt.s32.totalorder %s27_s13, %s27_s13 }
   0xa   :  { %p430_p3 = scmp.ne.s32.totalorder %s27_s13, %s429_s21  ;;  %p435_p5 = scmp.lt.s32.totalorder %s429_s21, %s429_s21 }
   0xc   :  { %p436_p6 = por %p435_p5, %p434_p4 }
   0xe   :  { %p437_p7 = pnand %p436_p6, %p430_p3 }
  0x10   :  { %440 = shalt.err (!%p437_p7)
}
  0x11   :  { %s514_s22 = smov 128   ;;  %s515_s23 = smov 8  }
  0x12   :  { %32 = dma.hbm_to_vmem [thread:$0]  %s608_s1, 7680, %s27_s13, [#allocation6], %s514_s22, %s514_s22, %s515_s23  }
  0x13   :  { %s516_s26 = smov [#allocation2]   ;;  %s517_s28 = smov [#allocation7]  }
  0x14   :  { %s17_s27 = sshll.u32 %s516_s26, 4  ;;  %s39_s29 = sshll.u32 %s517_s28, 4  ;;  %s18_s27 = int_to_ptr.vmem [resolvable:$true] %s17_s27  ;;  %s40_s29 = int_to_ptr.vmem [resolvable:$true] %s39_s29 }
  0x15   :  { %s441_s5 = scalar_lea.hbm %s607_s0, 256 }
  0x16   :  { %p442_p8 = scmp.ne.s32.totalorder %s607_s0, %s441_s5  ;;  %p445_p9 = scmp.lt.u32.totalorder %s441_s5, %s607_s0 }
  0x18   :  { %p447_p10 = pnand %p445_p9, %p442_p8 }
  0x1a   :  { %450 = shalt.err (!%p447_p10)
}
  0x1b   :  { %s451_s1 = scalar_lea.vmem %s18_s27, 256  ;;  %p456_p12 = scmp.lt.s32.totalorder %s18_s27, %s18_s27 }
  0x1c   :  { %p452_p11 = scmp.ne.s32.totalorder %s18_s27, %s451_s1  ;;  %p457_p13 = scmp.lt.s32.totalorder %s451_s1, %s451_s1 }
  0x1e   :  { %p458_p0 = por %p457_p13, %p456_p12 }
  0x20   :  { %p459_p1 = pnand %p458_p0, %p452_p11 }
  0x22   :  { %462 = shalt.err (!%p459_p1)
}
  0x23   :  { %20 = dma.hbm_to_vmem [thread:$0]  %s607_s0, 256, %s18_s27, [#allocation3]  }
  0x24   :  { %s463_s14 = scalar_lea.hbm %s609_s2, 128 }
  0x25   :  { %p464_p2 = scmp.ne.s32.totalorder %s609_s2, %s463_s14  ;;  %p467_p3 = scmp.lt.u32.totalorder %s463_s14, %s609_s2 }
  0x27   :  { %p469_p4 = pnand %p467_p3, %p464_p2 }
  0x29   :  { %472 = shalt.err (!%p469_p4)
}
  0x2a   :  { %s473_s19 = scalar_lea.vmem %s40_s29, 128  ;;  %p478_p6 = scmp.lt.s32.totalorder %s40_s29, %s40_s29 }
  0x2b   :  { %p474_p5 = scmp.ne.s32.totalorder %s40_s29, %s473_s19  ;;  %p479_p7 = scmp.lt.s32.totalorder %s473_s19, %s473_s19 }
  0x2d   :  { %p480_p8 = por %p479_p7, %p478_p6 }
  0x2f   :  { %p481_p9 = pnand %p480_p8, %p474_p5 }
  0x31   :  { %484 = shalt.err (!%p481_p9)
}
  0x32   :  { %42 = dma.hbm_to_vmem [thread:$0]  %s609_s2, 128, %s40_s29, [#allocation6]  }
  0x33   :  { %507 = dma.done.wait [#allocation3], 256  }
  0x34   :  { %508 = vsyncadd [#allocation3], 4294967040 }
  0x35   :  { %509 = dma.done.wait [#allocation6], 7808  }
  0x36   :  { %510 = vsyncadd [#allocation6], 4294959488  ;;  %v518_v0 = vmov 0.0|0.0   ;;  %v86_v1 = vld [vmem:[#allocation5 + $0x100] sm:$0xff]  ;;  %v87_v2 = vld [vmem:[#allocation5 + $0x108] sm:$0xff]  ;;  %vm124_vm0 = vcmask 785408  }
  0x37   :  { %368 = vmatprep.subr.bf16.mxu1 %v518_v0  ;;  %v88_v3 = vld [vmem:[#allocation5 + $0x110] sm:$0xff]  ;;  %v369_v4 = vpack.c.bf16 %v87_v2, %v86_v1  ;;  %v89_v5 = vld [vmem:[#allocation5 + $0x118] sm:$0xff]  ;;  %v90_v7 = vld [vmem:[#allocation5 + $0x120] sm:$0xff]  ;;  %s519_s2 = smov [#allocation8]  }
  0x38   :  { %v372_v6 = vpack.c.bf16 %v89_v5, %v88_v3  ;;  %v70_v8 = vld [vmem:[#allocation5 + $0x80] sm:$0xff]  ;;  %v71_v9 = vld [vmem:[#allocation5 + $0x88] sm:$0xff]  ;;  %v72_v15 = vld [vmem:[#allocation5 + $0x90] sm:$0xff]  ;;  %s287_s21 = sshll.u32 %s519_s2, 4  ;;  %s288_s21 = int_to_ptr.vmem [resolvable:$true] %s287_s21 }
  0x39   :  { %370 = vmatpush1.bf16.msra.mxu1 %v369_v4  ;;  %v91_v10 = vld [vmem:[#allocation5 + $0x128] sm:$0xff]  ;;  %v336_v11 = vpack.c.bf16 %v71_v9, %v70_v8  ;;  %v54_v12 = vld [vmem:[#allocation5] sm:$0xff]  ;;  %v73_v16 = vld [vmem:[#allocation5 + $0x98] sm:$0xff]  ;;  %s485_s22 = scalar_lea.vmem %s288_s21, 64  ;;  %p490_p11 = scmp.lt.s32.totalorder %s288_s21, %s288_s21 }
  0x3a   :  { %371 = vmatprep.subr.bf16.mxu1 %v518_v0  ;;  %v55_v13 = vld [vmem:[#allocation5 + $0x8] sm:$0xff]  ;;  %v340_v17 = vpack.c.bf16 %v73_v16, %v72_v15  ;;  %v56_v18 = vld [vmem:[#allocation5 + $0x10] sm:$0xff]  ;;  %v57_v19 = vld [vmem:[#allocation5 + $0x18] sm:$0xff]  ;;  %v375_v20 = vpack.c.bf16 %v91_v10, %v90_v7  ;;  %p486_p10 = scmp.ne.s32.totalorder %s288_s21, %s485_s22  ;;  %p491_p12 = scmp.lt.s32.totalorder %s485_s22, %s485_s22 }
  0x3b   :  { %v338_v14 = vpack.c.bf16 %v55_v13, %v54_v12  ;;  %337 = vmatprep.subr.bf16.mxu0 %v336_v11  ;;  %v92_v21 = vld [vmem:[#allocation5 + $0x130] sm:$0xff]  ;;  %v342_v22 = vpack.c.bf16 %v57_v19, %v56_v18  ;;  %v74_v23 = vld [vmem:[#allocation5 + $0xa0] sm:$0xff]  ;;  %v75_v24 = vld [vmem:[#allocation5 + $0xa8] sm:$0xff] }
  0x3c   :  { %v93_v25 = vld [vmem:[#allocation5 + $0x138] sm:$0xff]  ;;  %v344_v26 = vpack.c.bf16 %v75_v24, %v74_v23  ;;  %v58_v27 = vld [vmem:[#allocation5 + $0x20] sm:$0xff]  ;;  %v59_v28 = vld [vmem:[#allocation5 + $0x28] sm:$0xff]  ;;  %p492_p13 = por %p491_p12, %p490_p11 }
  0x3d   :  { %373 = vmatpush1.bf16.msra.mxu1 %v372_v6  ;;  %339 = vmatpush3.bf16.msra.mxu0 %v338_v14  ;;  %v76_v29 = vld [vmem:[#allocation5 + $0xb0] sm:$0xff]  ;;  %v77_v30 = vld [vmem:[#allocation5 + $0xb8] sm:$0xff]  ;;  %v378_v31 = vpack.c.bf16 %v93_v25, %v92_v21  ;;  %v94_v32 = vld [vmem:[#allocation5 + $0x140] sm:$0xff]  ;;  %v346_v33 = vpack.c.bf16 %v59_v28, %v58_v27 }
  0x3e   :  { %374 = vmatprep.subr.bf16.mxu1 %v518_v0  ;;  %341 = vmatprep.subr.bf16.mxu0 %v340_v17  ;;  %v95_v34 = vld [vmem:[#allocation5 + $0x148] sm:$0xff]  ;;  %v348_v35 = vpack.c.bf16 %v77_v30, %v76_v29  ;;  %v60_v36 = vld [vmem:[#allocation5 + $0x30] sm:$0xff]  ;;  %v61_v37 = vld [vmem:[#allocation5 + $0x38] sm:$0xff]  ;;  %p493_p0 = pnand %p492_p13, %p486_p10 }
  0x3f   :  { %v78_v38 = vld [vmem:[#allocation5 + $0xc0] sm:$0xff]  ;;  %v79_v39 = vld [vmem:[#allocation5 + $0xc8] sm:$0xff]  ;;  %v381_v40 = vpack.c.bf16 %v95_v34, %v94_v32  ;;  %v96_v41 = vld [vmem:[#allocation5 + $0x150] sm:$0xff]  ;;  %v350_v42 = vpack.c.bf16 %v61_v37, %v60_v36 }
  0x40   :  { %v97_v43 = vld [vmem:[#allocation5 + $0x158] sm:$0xff]  ;;  %v352_v44 = vpack.c.bf16 %v79_v39, %v78_v38  ;;  %v62_v45 = vld [vmem:[#allocation5 + $0x40] sm:$0xff]  ;;  %v63_v46 = vld [vmem:[#allocation5 + $0x48] sm:$0xff] }
  0x41   :  { %376 = vmatpush1.bf16.msra.mxu1 %v375_v20  ;;  %343 = vmatpush3.bf16.msra.mxu0 %v342_v22  ;;  %v80_v47 = vld [vmem:[#allocation5 + $0xd0] sm:$0xff]  ;;  %v81_v48 = vld [vmem:[#allocation5 + $0xd8] sm:$0xff]  ;;  %v384_v50 = vpack.c.bf16 %v97_v43, %v96_v41  ;;  %v98_v51 = vld [vmem:[#allocation5 + $0x160] sm:$0xff]  ;;  %v354_v53 = vpack.c.bf16 %v63_v46, %v62_v45 }
  0x42   :  { %377 = vmatprep.subr.bf16.mxu1 %v518_v0  ;;  %345 = vmatprep.subr.bf16.mxu0 %v344_v26  ;;  %v52_v49 = vld [vmem:[#allocation2] sm:$0xff]  ;;  %v99_v52 = vld [vmem:[#allocation5 + $0x168] sm:$0xff]  ;;  %v356_v55 = vpack.c.bf16 %v81_v48, %v80_v47  ;;  %v65_v57 = vld [vmem:[#allocation5 + $0x58] sm:$0xff] }
  0x43   :  { %v121_v54 = vcombine.high %v52_v49, %v52_v49  ;;  %v64_v56 = vld [vmem:[#allocation5 + $0x50] sm:$0xff]  ;;  %v582_v58 = vld [vmem:[#allocation2 + $0x8] sm:$0xff]  ;;  %v82_v59 = vld [vmem:[#allocation5 + $0xe0] sm:$0xff]  ;;  %v387_v62 = vpack.c.bf16 %v99_v52, %v98_v51 }
  0x44   :  { %v83_v60 = vld [vmem:[#allocation5 + $0xe8] sm:$0xff]  ;;  %v122_v61 = vcombine.high %v582_v58, %v582_v58  ;;  %v100_v63 = vld [vmem:[#allocation5 + $0x170] sm:$0xff]  ;;  %v358_v1 = vpack.c.bf16 %v65_v57, %v64_v56  ;;  %v101_v2 = vld [vmem:[#allocation5 + $0x178] sm:$0xff] }
  0x45   :  { %379 = vmatpush1.bf16.msra.mxu1 %v378_v31  ;;  %347 = vmatpush3.bf16.msra.mxu0 %v346_v33  ;;  %v360_v3 = vpack.c.bf16 %v83_v60, %v82_v59  ;;  %v66_v4 = vld [vmem:[#allocation5 + $0x60] sm:$0xff]  ;;  %v67_v5 = vld [vmem:[#allocation5 + $0x68] sm:$0xff]  ;;  %v84_v6 = vld [vmem:[#allocation5 + $0xf0] sm:$0xff]  ;;  %v390_v8 = vpack.c.bf16 %v101_v2, %v100_v63 }
  0x46   :  { %380 = vmatprep.subr.bf16.mxu1 %v518_v0  ;;  %349 = vmatprep.subr.bf16.mxu0 %v348_v35  ;;  %v85_v7 = vld [vmem:[#allocation5 + $0xf8] sm:$0xff]  ;;  %v102_v9 = vld [vmem:[#allocation5 + $0x180] sm:$0xff]  ;;  %v362_v10 = vpack.c.bf16 %v67_v5, %v66_v4  ;;  %v103_v11 = vld [vmem:[#allocation5 + $0x188] sm:$0xff] }
  0x47   :  { %191 = vmatprep.mubr.f32.mxu0 %v121_v54  ;;  %298 = vmatprep.mubr.msk.f32.mxu1 %vm124_vm0, %v122_v61  ;;  %v364_v12 = vpack.c.bf16 %v85_v7, %v84_v6  ;;  %v68_v13 = vld [vmem:[#allocation5 + $0x70] sm:$0xff]  ;;  %v69_v14 = vld [vmem:[#allocation5 + $0x78] sm:$0xff]  ;;  %v393_v15 = vpack.c.bf16 %v103_v11, %v102_v9  ;;  %v106_v20 = vld [vmem:[#allocation5 + $0x1a0] sm:$0xff] }
  0x48   :  { %v366_v16 = vpack.c.bf16 %v69_v14, %v68_v13  ;;  %v104_v17 = vld [vmem:[#allocation5 + $0x190] sm:$0xff]  ;;  %v105_v18 = vld [vmem:[#allocation5 + $0x198] sm:$0xff]  ;;  %v107_v21 = vld [vmem:[#allocation5 + $0x1a8] sm:$0xff] }
  0x49   :  { %382 = vmatpush1.bf16.msra.mxu1 %v381_v40  ;;  %351 = vmatpush3.bf16.msra.mxu0 %v350_v42  ;;  %v396_v19 = vpack.c.bf16 %v105_v18, %v104_v17  ;;  %v399_v22 = vpack.c.bf16 %v107_v21, %v106_v20  ;;  %v108_v23 = vld [vmem:[#allocation5 + $0x1b0] sm:$0xff]  ;;  %v109_v24 = vld [vmem:[#allocation5 + $0x1b8] sm:$0xff]  ;;  %v110_v26 = vld [vmem:[#allocation5 + $0x1c0] sm:$0xff] }
  0x4a   :  { %383 = vmatprep.subr.bf16.mxu1 %v518_v0  ;;  %353 = vmatprep.subr.bf16.mxu0 %v352_v44  ;;  %v402_v25 = vpack.c.bf16 %v109_v24, %v108_v23  ;;  %v111_v27 = vld [vmem:[#allocation5 + $0x1c8] sm:$0xff]  ;;  %v112_v29 = vld [vmem:[#allocation5 + $0x1d0] sm:$0xff]  ;;  %v113_v30 = vld [vmem:[#allocation5 + $0x1d8] sm:$0xff] }
  0x4b   :  { %v405_v28 = vpack.c.bf16 %v111_v27, %v110_v26  ;;  %v408_v31 = vpack.c.bf16 %v113_v30, %v112_v29  ;;  %v297_v35 = vld [vmem:[#allocation7] ss:$0 sm:$0xff]  ;;  %v299_v40 = vld [vmem:[#allocation7 + $0x1] ss:$0 sm:$0xff]  ;;  %v300_v42 = vld [vmem:[#allocation7 + $0x2] ss:$0 sm:$0xff] }
  0x4d   :  { %385 = vmatpush1.bf16.msra.mxu1 %v384_v50  ;;  %355 = vmatpush3.bf16.msra.mxu0 %v354_v53 }
  0x4e   :  { %386 = vmatprep.subr.bf16.mxu1 %v518_v0  ;;  %357 = vmatprep.subr.bf16.mxu0 %v356_v55 }
  0x51   :  { %388 = vmatpush1.bf16.msra.mxu1 %v387_v62  ;;  %359 = vmatpush3.bf16.msra.mxu0 %v358_v1 }
  0x52   :  { %389 = vmatprep.subr.bf16.mxu1 %v518_v0  ;;  %361 = vmatprep.subr.bf16.mxu0 %v360_v3 }
  0x55   :  { %391 = vmatpush1.bf16.msra.mxu1 %v390_v8  ;;  %363 = vmatpush3.bf16.msra.mxu0 %v362_v10 }
  0x56   :  { %392 = vmatprep.subr.bf16.mxu1 %v518_v0  ;;  %365 = vmatprep.subr.bf16.mxu0 %v364_v12 }
  0x59   :  { %394 = vmatpush1.bf16.msra.mxu1 %v393_v15  ;;  %367 = vmatpush3.bf16.msra.mxu0 %v366_v16 }
  0x5a   :  { %395 = vmatprep.subr.bf16.mxu1 %v518_v0 }
  0x5c   :  { %192 = vmatmul.mubr.f32.vlgmr.msra.gmra.mrb[0].mxu0 %v52_v49 }
  0x5d   :  { %397 = vmatpush1.bf16.msra.mxu1 %v396_v19 }
  0x5e   :  { %398 = vmatprep.subr.bf16.mxu1 %v518_v0 }
  0x61   :  { %400 = vmatpush1.bf16.msra.mxu1 %v399_v22 }
  0x62   :  { %401 = vmatprep.subr.bf16.mxu1 %v518_v0 }
  0x65   :  { %403 = vmatpush1.bf16.msra.mxu1 %v402_v25 }
  0x66   :  { %404 = vmatprep.subr.bf16.mxu1 %v518_v0 }
  0x69   :  { %406 = vmatpush1.bf16.msra.mxu1 %v405_v28 }
  0x6a   :  { %407 = vmatprep.subr.bf16.mxu1 %v518_v0 }
  0x6d   :  { %409 = vmatpush1.bf16.msra.mxu1 %v408_v31 }
  0x70   :  { %262 = vmatmul.mubr.f32.vlgmr.msra.gmra.mrb[0].mxu1 %v582_v58 }
 0x12f   :  { %v333_v32 = vpop.f32.mrb[0].mxu0 }
 0x130   :  { %v334_v33 = vpop.f32.mrb[1].mxu0 }
 0x131   :  { %v335_v34 = vadd.f32 %v334_v33, %v333_v32 }
 0x133   :  { %v194_v36 = vadd.f32 %v335_v34, %v297_v35 }
 0x143   :  { %v263_v37 = vpop.f32.mrb[0].mxu1 }
 0x144   :  { %v264_v38 = vadd.f32 %v263_v37, %v194_v36  ;;  %v265_v39 = vpop.f32.mrb[1].mxu1 }
 0x146   :  { %v267_v41 = vmax.f32 %v264_v38, 0.0 }
 0x148   :  { %v273_v43 = vmul.f32 %v299_v40, %v267_v41 }
 0x14a   :  { %v279_v44 = vadd.f32 %v300_v42, %v273_v43 }
 0x14c   :  { %280 = vst [vmem:[#allocation8] sm:$0xf] %v279_v44 }
 0x14d   :  { %496 = shalt.err (!%p493_p0)
}
 0x14e   :  { %s497_s25 = scalar_lea.hbm %s610_s3, 64 }
 0x14f   :  { %p498_p1 = scmp.ne.s32.totalorder %s610_s3, %s497_s25  ;;  %p501_p2 = scmp.lt.u32.totalorder %s497_s25, %s610_s3 }
 0x151   :  { %p503_p3 = pnand %p501_p2, %p498_p1 }
 0x153   :  { %506 = shalt.err (!%p503_p3)
}
 0x154   :  { %290 = dma.vmem_to_hbm [thread:$0]  %s288_s21, 64, %s610_s3, [#allocation4]  }
 0x155   :  { %511 = dma.done.wait [#allocation4], 64  }
 0x156   :  { %512 = vsyncadd [#allocation4], 4294967232 }
 0x157   :  { %294 = vsyncpa [#allocation3], 1 }
 0x158   :  { %295 = vsyncpa [#allocation6], 1 }
 0x159   :  { %296 = vsyncpa [#allocation4], 1 }

</bundles_post_ra>
